<compile_context>
chip_gen: v7x
topology: tpu7x:2x2x1
jax: 0.10.0
libtpu: 0.0.40
codegen_flags: <defaults>
</compile_context>

<pallas_src>
import jax
import jax.numpy as jnp
from jax.experimental import pallas as pl
from jax.experimental.pallas import tpu as pltpu

HIDDEN_SIZE = 16
INPUT_SIZE = 1
OUTPUT_SIZE = 1


def _rnn_kernel(x_ref, wih_ref, whh_ref, b_ref, wfc_ref, bfc_ref, out_ref):
    """Whole-sequence Elman RNN + final Linear in one kernel invocation.

    x_ref   : (T, B, I)  full input sequence, TIME-MAJOR
    wih_ref : (I, H)     input->hidden weight (pre-transposed)
    whh_ref : (H, H)     hidden->hidden weight (pre-transposed)
    b_ref   : (1, H)     b_ih + b_hh (fused)
    wfc_ref : (O, H)     final linear weight (PyTorch layout)
    bfc_ref : (1, O)     final linear bias
    out_ref : (B, O)     fc(h_T)
    """
    T, B, I = x_ref.shape
    H = whh_ref.shape[0]
    O = wfc_ref.shape[0]

    whh = whh_ref[...]                          # (H, H)
    bias = b_ref[...].reshape(1, 1, H)          # (1, 1, H)

    # ---- input projection for ALL timesteps, off the serial chain ----------
    # Time-major result (T, B, H): pre[t] is a zero-cost leading-axis select.
    if I == 1:
        # (T, B, 1) * (1, 1, H) + (1, 1, H) -> (T, B, H): pure VPU broadcast,
        # no degenerate K=1 matmul.
        pre = x_ref[...] * wih_ref[...].reshape(1, 1, H) + bias
    else:
        pre = (
            jnp.einsum(
                "tbi,ih->tbh", x_ref[...], wih_ref[...],
                preferred_element_type=jnp.float32,
            )
            + bias
        )

    # ---- serial recurrence: h_t = tanh(h_{t-1} @ W_hh^T + pre[t]) ----------
    # h_{-1} == 0, so the first step needs no matmul.
    h = jnp.tanh(pre[0])                         # (B, H)
    for t in range(1, T):                        # static unroll, T small
        h = jnp.tanh(
            jnp.dot(h, whh, preferred_element_type=jnp.float32) + pre[t]
        )

    # ---- final linear on the last hidden state ------------------------------
    if O == 1:
        # (B, H) * (1, H) -> lane reduce: avoids an MXU round trip for a
        # single output column at the end of the serial chain.
        out = jnp.sum(h * wfc_ref[...], axis=-1, keepdims=True) + bfc_ref[...]
    else:
        out = (
            jnp.dot(h, jnp.transpose(wfc_ref[...]),
                    preferred_element_type=jnp.float32)
            + bfc_ref[...]
        )
    out_ref[...] = out.astype(out_ref.dtype)


def prepare_params(params):
    """One-time weight layout prep (outside the per-call hot path)."""
    w_ih, b_ih, w_hh, b_hh, w_fc, b_fc = params
    H = w_hh.shape[0]
    O = w_fc.shape[0]
    wih_t = jnp.transpose(w_ih)                  # (I, H)
    whh_t = jnp.transpose(w_hh)                  # (H, H)
    b = (b_ih + b_hh).reshape(1, H)              # (1, H) fused RNN bias
    bfc = b_fc.reshape(1, O)                     # (1, O)
    return (wih_t, whh_t, b, w_fc, bfc)          # w_fc kept (O, H) for VPU path


@jax.jit
def simple_rnn_forward(x, prepared):
    """x: (B, T, I) float32, batch-first (same as the PyTorch module)."""
    wih_t, whh_t, b, w_fc, bfc = prepared
    B, T, I = x.shape
    O = w_fc.shape[0]

    # Single tiny per-call layout op (fused under jit): time-major x so the
    # in-kernel recurrence indexes pre[t] on the leading axis.
    x_tm = jnp.transpose(x, (1, 0, 2))           # (T, B, I)

    vmem = pltpu.MemorySpace.VMEM
    out = pl.pallas_call(
        _rnn_kernel,
        out_shape=jax.ShapeDtypeStruct((B, O), jnp.float32),
        # Single invocation (no grid): every operand is whole-array resident
        # in VMEM, so there is no per-timestep pipeline/DMA overhead.
        in_specs=[
            pl.BlockSpec(memory_space=vmem),     # x (T, B, I)
            pl.BlockSpec(memory_space=vmem),     # W_ih^T
            pl.BlockSpec(memory_space=vmem),     # W_hh^T
            pl.BlockSpec(memory_space=vmem),     # fused bias
            pl.BlockSpec(memory_space=vmem),     # W_fc (O, H)
            pl.BlockSpec(memory_space=vmem),     # b_fc
        ],
        out_specs=pl.BlockSpec(memory_space=vmem),
    )(x_tm, wih_t, whh_t, b, w_fc, bfc)
    return out


def init_params(key, input_size, hidden_size, output_size):
    """Deterministic parameter init (same shapes as nn.RNN + nn.Linear)."""
    k = jax.random.split(key, 6)
    s = 1.0 / jnp.sqrt(hidden_size)
    w_ih = jax.random.uniform(k[0], (hidden_size, input_size), jnp.float32, -s, s)
    b_ih = jax.random.uniform(k[1], (hidden_size,), jnp.float32, -s, s)
    w_hh = jax.random.uniform(k[2], (hidden_size, hidden_size), jnp.float32, -s, s)
    b_hh = jax.random.uniform(k[3], (hidden_size,), jnp.float32, -s, s)
    w_fc = jax.random.uniform(k[4], (output_size, hidden_size), jnp.float32, -s, s)
    b_fc = jax.random.uniform(k[5], (output_size,), jnp.float32, -s, s)
    return (w_ih, b_ih, w_hh, b_hh, w_fc, b_fc)


def reference_forward(x, params):
    """Pure-JAX reference mirroring the PyTorch forward, for a sanity check."""
    w_ih, b_ih, w_hh, b_hh, w_fc, b_fc = params
    B, T, I = x.shape
    H = w_hh.shape[0]

    def step(h, x_t):
        h_new = jnp.tanh(x_t @ w_ih.T + b_ih + h @ w_hh.T + b_hh)
        return h_new, None

    h0 = jnp.zeros((B, H), jnp.float32)
    h_last, _ = jax.lax.scan(step, h0, jnp.transpose(x, (1, 0, 2)))
    return h_last @ w_fc.T + b_fc


if __name__ == "__main__":
    key = jax.random.PRNGKey(0)
    k_x, k_p = jax.random.split(key)

    batch, seq = 2, 8
    x = jax.random.normal(k_x, (batch, seq, INPUT_SIZE), jnp.float32)
    params = init_params(k_p, INPUT_SIZE, HIDDEN_SIZE, OUTPUT_SIZE)

    prepared = prepare_params(params)            # one-time layout prep
    out = simple_rnn_forward(x, prepared)
    out = jax.block_until_ready(out)

    ref = reference_forward(x, params)
    assert out.shape == (batch, OUTPUT_SIZE)
    assert jnp.allclose(out, ref, atol=1e-5, rtol=1e-5), (out, ref)

    print("KERNEL_OK")
</pallas_src>

<mosaic_0001>
module attributes {stable_mosaic.version = 11 : i64} {
  func.func @_rnn_kernel(%arg0: memref<8x2x1xf32, #tpu.memory_space<vmem>>, %arg1: memref<1x16xf32, #tpu.memory_space<vmem>>, %arg2: memref<16x16xf32, #tpu.memory_space<vmem>>, %arg3: memref<1x16xf32, #tpu.memory_space<vmem>>, %arg4: memref<1x16xf32, #tpu.memory_space<vmem>>, %arg5: memref<1x1xf32, #tpu.memory_space<vmem>>, %arg6: memref<2x1xf32, #tpu.memory_space<vmem>>) attributes {dimension_semantics = [], scalar_prefetch = 0 : i64, scratch_operands = 0 : i64, tpu.core_type = #tpu.core_type<tc>} {
    %c0 = arith.constant 0 : index
    %c0_0 = arith.constant 0 : index
    %0 = vector.load %arg2[%c0, %c0_0] : memref<16x16xf32, #tpu.memory_space<vmem>>, vector<16x16xf32>
    %c0_1 = arith.constant 0 : index
    %c0_2 = arith.constant 0 : index
    %1 = vector.load %arg3[%c0_1, %c0_2] : memref<1x16xf32, #tpu.memory_space<vmem>>, vector<1x16xf32>
    %2 = vector.shape_cast %1 : vector<1x16xf32> to vector<1x1x16xf32>
    %c0_3 = arith.constant 0 : index
    %c0_4 = arith.constant 0 : index
    %c0_5 = arith.constant 0 : index
    %3 = vector.load %arg0[%c0_3, %c0_4, %c0_5] : memref<8x2x1xf32, #tpu.memory_space<vmem>>, vector<8x2x1xf32>
    %c0_6 = arith.constant 0 : index
    %c0_7 = arith.constant 0 : index
    %4 = vector.load %arg1[%c0_6, %c0_7] : memref<1x16xf32, #tpu.memory_space<vmem>>, vector<1x16xf32>
    %5 = vector.shape_cast %4 : vector<1x16xf32> to vector<1x1x16xf32>
    %6 = vector.broadcast %3 : vector<8x2x1xf32> to vector<8x2x16xf32>
    %7 = vector.broadcast %5 : vector<1x1x16xf32> to vector<8x2x16xf32>
    %8 = arith.mulf %6, %7 : vector<8x2x16xf32>
    %9 = vector.broadcast %2 : vector<1x1x16xf32> to vector<8x2x16xf32>
    %10 = arith.addf %8, %9 : vector<8x2x16xf32>
    %11 = vector.extract_strided_slice %10 {offsets = [0, 0, 0], sizes = [1, 2, 16], strides = [1, 1, 1]} : vector<8x2x16xf32> to vector<1x2x16xf32>
    %12 = vector.shape_cast %11 : vector<1x2x16xf32> to vector<2x16xf32>
    %13 = math.tanh %12 : vector<2x16xf32>
    %cst = arith.constant dense<0.000000e+00> : vector<2x16xf32>
    %14 = tpu.matmul %13, %0, %cst {dimension_numbers = #tpu.dot_dimension_numbers<[1], [0], [0], [1], [0, 0, 1, 1], [], []>} : vector<2x16xf32>, vector<16x16xf32>, vector<2x16xf32> -> vector<2x16xf32>
    %15 = vector.extract_strided_slice %10 {offsets = [1, 0, 0], sizes = [1, 2, 16], strides = [1, 1, 1]} : vector<8x2x16xf32> to vector<1x2x16xf32>
    %16 = vector.shape_cast %15 : vector<1x2x16xf32> to vector<2x16xf32>
    %17 = arith.addf %14, %16 : vector<2x16xf32>
    %18 = math.tanh %17 : vector<2x16xf32>
    %cst_8 = arith.constant dense<0.000000e+00> : vector<2x16xf32>
    %19 = tpu.matmul %18, %0, %cst_8 {dimension_numbers = #tpu.dot_dimension_numbers<[1], [0], [0], [1], [0, 0, 1, 1], [], []>} : vector<2x16xf32>, vector<16x16xf32>, vector<2x16xf32> -> vector<2x16xf32>
    %20 = vector.extract_strided_slice %10 {offsets = [2, 0, 0], sizes = [1, 2, 16], strides = [1, 1, 1]} : vector<8x2x16xf32> to vector<1x2x16xf32>
    %21 = vector.shape_cast %20 : vector<1x2x16xf32> to vector<2x16xf32>
    %22 = arith.addf %19, %21 : vector<2x16xf32>
    %23 = math.tanh %22 : vector<2x16xf32>
    %cst_9 = arith.constant dense<0.000000e+00> : vector<2x16xf32>
    %24 = tpu.matmul %23, %0, %cst_9 {dimension_numbers = #tpu.dot_dimension_numbers<[1], [0], [0], [1], [0, 0, 1, 1], [], []>} : vector<2x16xf32>, vector<16x16xf32>, vector<2x16xf32> -> vector<2x16xf32>
    %25 = vector.extract_strided_slice %10 {offsets = [3, 0, 0], sizes = [1, 2, 16], strides = [1, 1, 1]} : vector<8x2x16xf32> to vector<1x2x16xf32>
    %26 = vector.shape_cast %25 : vector<1x2x16xf32> to vector<2x16xf32>
    %27 = arith.addf %24, %26 : vector<2x16xf32>
    %28 = math.tanh %27 : vector<2x16xf32>
    %cst_10 = arith.constant dense<0.000000e+00> : vector<2x16xf32>
    %29 = tpu.matmul %28, %0, %cst_10 {dimension_numbers = #tpu.dot_dimension_numbers<[1], [0], [0], [1], [0, 0, 1, 1], [], []>} : vector<2x16xf32>, vector<16x16xf32>, vector<2x16xf32> -> vector<2x16xf32>
    %30 = vector.extract_strided_slice %10 {offsets = [4, 0, 0], sizes = [1, 2, 16], strides = [1, 1, 1]} : vector<8x2x16xf32> to vector<1x2x16xf32>
    %31 = vector.shape_cast %30 : vector<1x2x16xf32> to vector<2x16xf32>
    %32 = arith.addf %29, %31 : vector<2x16xf32>
    %33 = math.tanh %32 : vector<2x16xf32>
    %cst_11 = arith.constant dense<0.000000e+00> : vector<2x16xf32>
    %34 = tpu.matmul %33, %0, %cst_11 {dimension_numbers = #tpu.dot_dimension_numbers<[1], [0], [0], [1], [0, 0, 1, 1], [], []>} : vector<2x16xf32>, vector<16x16xf32>, vector<2x16xf32> -> vector<2x16xf32>
    %35 = vector.extract_strided_slice %10 {offsets = [5, 0, 0], sizes = [1, 2, 16], strides = [1, 1, 1]} : vector<8x2x16xf32> to vector<1x2x16xf32>
    %36 = vector.shape_cast %35 : vector<1x2x16xf32> to vector<2x16xf32>
    %37 = arith.addf %34, %36 : vector<2x16xf32>
    %38 = math.tanh %37 : vector<2x16xf32>
    %cst_12 = arith.constant dense<0.000000e+00> : vector<2x16xf32>
    %39 = tpu.matmul %38, %0, %cst_12 {dimension_numbers = #tpu.dot_dimension_numbers<[1], [0], [0], [1], [0, 0, 1, 1], [], []>} : vector<2x16xf32>, vector<16x16xf32>, vector<2x16xf32> -> vector<2x16xf32>
    %40 = vector.extract_strided_slice %10 {offsets = [6, 0, 0], sizes = [1, 2, 16], strides = [1, 1, 1]} : vector<8x2x16xf32> to vector<1x2x16xf32>
    %41 = vector.shape_cast %40 : vector<1x2x16xf32> to vector<2x16xf32>
    %42 = arith.addf %39, %41 : vector<2x16xf32>
    %43 = math.tanh %42 : vector<2x16xf32>
    %cst_13 = arith.constant dense<0.000000e+00> : vector<2x16xf32>
    %44 = tpu.matmul %43, %0, %cst_13 {dimension_numbers = #tpu.dot_dimension_numbers<[1], [0], [0], [1], [0, 0, 1, 1], [], []>} : vector<2x16xf32>, vector<16x16xf32>, vector<2x16xf32> -> vector<2x16xf32>
    %45 = vector.extract_strided_slice %10 {offsets = [7, 0, 0], sizes = [1, 2, 16], strides = [1, 1, 1]} : vector<8x2x16xf32> to vector<1x2x16xf32>
    %46 = vector.shape_cast %45 : vector<1x2x16xf32> to vector<2x16xf32>
    %47 = arith.addf %44, %46 : vector<2x16xf32>
    %48 = math.tanh %47 : vector<2x16xf32>
    %c0_14 = arith.constant 0 : index
    %c0_15 = arith.constant 0 : index
    %49 = vector.load %arg4[%c0_14, %c0_15] : memref<1x16xf32, #tpu.memory_space<vmem>>, vector<1x16xf32>
    %50 = vector.broadcast %49 : vector<1x16xf32> to vector<2x16xf32>
    %51 = arith.mulf %48, %50 : vector<2x16xf32>
    %cst_16 = arith.constant dense<0.000000e+00> : vector<2xf32>
    %52 = vector.multi_reduction <add>, %51, %cst_16 [1] : vector<2x16xf32> to vector<2xf32>
    %53 = vector.shape_cast %52 : vector<2xf32> to vector<2x1xf32>
    %c0_17 = arith.constant 0 : index
    %c0_18 = arith.constant 0 : index
    %54 = vector.load %arg5[%c0_17, %c0_18] : memref<1x1xf32, #tpu.memory_space<vmem>>, vector<1x1xf32>
    %55 = vector.broadcast %54 : vector<1x1xf32> to vector<2x1xf32>
    %56 = arith.addf %53, %55 : vector<2x1xf32>
    %c0_19 = arith.constant 0 : index
    %c0_20 = arith.constant 0 : index
    %57 = vector.load %arg6[%c0_19, %c0_20] : memref<2x1xf32, #tpu.memory_space<vmem>>, vector<2x1xf32>
    tpu.vector_store %arg6[%c0_19, %c0_20], %56 {strides = array<i32>} : memref<2x1xf32, #tpu.memory_space<vmem>>, vector<2x1xf32>,
    return
  }
}

</mosaic_0001>

<bundles_post_ra>
// kernel: simple_rnn_forward.1
= control target key start
LH: loop header
LB: loop body
LE: loop exit
PB: predicated region body
PF: predicated region fallthrough
CT: control target
= control target key end

     0   :  { %v775_v0 = vmov 0   ;;  %v776_v5 = vmov 0.0|0.0   ;;  %vm777_vm0 = vmmov 0   ;;  %v778_v9 = vmov 0.0   ;;  %s909_s0 = inlined_call_operand.vmem [shape: f32[8,2,1], index: 0, kind: input, shape index: {}]   ;;  %s910_s2 = inlined_call_operand.vmem [shape: f32[16,16], index: 2, kind: input, shape index: {}]   ;;  %s911_s1 = inlined_call_operand.vmem [shape: f32[1,16], index: 1, kind: input, shape index: {}]   ;;  %s912_s3 = inlined_call_operand.vmem [shape: f32[1,16], index: 3, kind: input, shape index: {}]   ;;  %s913_s5 = inlined_call_operand.<no memory space> [shape: f32[1,1], index: 5, kind: input, shape index: {}]   ;;  %s914_s4 = inlined_call_operand.vmem [shape: f32[1,16], index: 4, kind: input, shape index: {}]   ;;  %s915_s6 = inlined_call_operand.vmem [shape: f32[2,1], index: 6, kind: output, shape index: {}]  }
   0x1   :  { %757 = vset.pattern.permute.xlu0 %v775_v0  ;;  %v28_v1 = vld [vmem:[%s909_s0] sm:$0x3]  ;;  %758 = vset.pattern.permute.xlu1 %v775_v0  ;;  %v29_v2 = vld [vmem:[%s909_s0 + $0x2] sm:$0x3]  ;;  %v32_v3 = vld [vmem:[%s909_s0 + $0x8] sm:$0x3]  ;;  %v11_v62 = vstv %s913_s5 }
   0x2   :  { %39 = vperm.xlu0 %757, %v28_v1   ;;  %v34_v4 = vld [vmem:[%s909_s0 + $0xc] sm:$0x3]  ;;  %732 = vmatprep.subr.bf16.mxu0 %v776_v5  ;;  %v25_v6 = vld [vmem:[%s910_s2] sm:$0xff]  ;;  %vm106_vm1 = vcmask 130048   ;;  %v33_v18 = vld [vmem:[%s909_s0 + $0xa] sm:$0x3] }
   0x3   :  { %v26_v7 = vld [vmem:[%s910_s2 + $0x8] sm:$0xff]  ;;  %735 = vmatprep.subr.bf16.mxu1 %v776_v5  ;;  %687 = vmatprep.mubr.msk.f32.mxu0 %vm777_vm0, %v778_v9  ;;  %v843_v10 = vld [vmem:[%s911_s1] ss:$0 sm:$0xff]  ;;  %v30_v16 = vld [vmem:[%s909_s0 + $0x4] sm:$0x3]  ;;  %vm633_vm2 = vcmask 123904  }
   0x4   :  { %v832_v8 = vpack.c.bf16 %v26_v7, %v25_v6  ;;  %694 = vmatprep.mubr.msk.f32.mxu1 %vm777_vm0, %v778_v9  ;;  %v848_v11 = vld [vmem:[%s912_s3] ss:$0 sm:$0xff]  ;;  %49 = vperm.xlu1 %758, %v30_v16   ;;  %v31_v17 = vld [vmem:[%s909_s0 + $0x6] sm:$0x3]  ;;  %v35_v19 = vld [vmem:[%s909_s0 + $0xe] sm:$0x3] }
   0x5   :  { %12 = vst [vmem:[#allocation2] sm:$0x1] %v11_v62  ;;  %vm645_vm3 = vcmask 1024  }
   0x6   :  { %44 = vperm.xlu0 %757, %v29_v2   ;;  %734 = vmatpush3.bf16.msra.mxu0 %v832_v8 }
   0x7   :  { %737 = vmatpush3.bf16.msra.mxu1 %v832_v8  ;;  %738 = vmatprep.subr.bf16.mxu0 %v776_v5 }
   0x8   :  { %741 = vmatprep.subr.bf16.mxu1 %v776_v5  ;;  %54 = vperm.xlu1 %758, %v31_v17  }
   0xa   :  { %59 = vperm.xlu0 %757, %v32_v3  }
   0xc   :  { %64 = vperm.xlu1 %758, %v33_v18  }
   0xe   :  { %69 = vperm.xlu0 %757, %v34_v4  }
  0x10   :  { %74 = vperm.xlu1 %758, %v35_v19  }
  0x81   :  { %v40_v12 = vpop.permute.xlu0 %39 }
  0x82   :  { %v83_v13 = vmul.f32 %v843_v10, %v40_v12 }
  0x83   :  { %v50_v27 = vpop.permute.xlu1 %49 }
  0x84   :  { %v97_v14 = vadd.f32 %v848_v11, %v83_v13  ;;  %v85_v28 = vmul.f32 %v843_v10, %v50_v27 }
  0x85   :  { %v45_v20 = vpop.permute.xlu0 %44 }
  0x86   :  { %759 = vtanh.f32 %v97_v14  ;;  %v84_v21 = vmul.f32 %v843_v10, %v45_v20  ;;  %v99_v29 = vadd.f32 %v848_v11, %v85_v28 }
  0x87   :  { %v55_v34 = vpop.permute.xlu1 %54 }
  0x88   :  { %v98_v22 = vadd.f32 %v848_v11, %v84_v21  ;;  %v86_v35 = vmul.f32 %v843_v10, %v55_v34 }
  0x89   :  { %v60_v41 = vpop.permute.xlu0 %59 }
  0x8a   :  { %v100_v36 = vadd.f32 %v848_v11, %v86_v35  ;;  %v87_v42 = vmul.f32 %v843_v10, %v60_v41 }
  0x8b   :  { %v65_v48 = vpop.permute.xlu1 %64 }
  0x8c   :  { %v101_v43 = vadd.f32 %v848_v11, %v87_v42  ;;  %v88_v49 = vmul.f32 %v843_v10, %v65_v48 }
  0x8d   :  { %v70_v55 = vpop.permute.xlu0 %69 }
  0x8e   :  { %v102_v50 = vadd.f32 %v848_v11, %v88_v49  ;;  %v89_v56 = vmul.f32 %v843_v10, %v70_v55 }
  0x8f   :  { %v75_v63 = vpop.permute.xlu1 %74 }
  0x90   :  { %v760_v15 = vpop.eup %759  ;;  %v103_v57 = vadd.f32 %v848_v11, %v89_v56  ;;  %v90_v0 = vmul.f32 %v843_v10, %v75_v63 }
  0x91   :  { %688 = vmatmul.mubr.msk.f32.vlgmr.msra.gmra.mrb[0].mxu0 %vm106_vm1, %v760_v15 }
  0x92   :  { %740 = vmatpush3.bf16.msra.mxu0 %v832_v8  ;;  %701 = vmatprep.mubr.msk.f32.mxu0 %vm777_vm0, %v778_v9  ;;  %v104_v1 = vadd.f32 %v848_v11, %v90_v0 }
  0x93   :  { %744 = vmatprep.subr.bf16.mxu0 %v776_v5 }
 0x164   :  { %v176_v23 = vpop.f32.mrb[0].mxu0 }
 0x165   :  { %v177_v24 = vadd.f32 %v176_v23, %v98_v22  ;;  %v689_v25 = vpop.f32.mrb[1].mxu0 }
 0x167   :  { %761 = vtanh.f32 %v177_v24 }
 0x171   :  { %v762_v26 = vpop.eup %761 }
 0x172   :  { %695 = vmatmul.mubr.msk.f32.vlgmr.msra.gmra.mrb[0].mxu1 %vm106_vm1, %v762_v26 }
 0x173   :  { %743 = vmatpush3.bf16.msra.mxu1 %v832_v8  ;;  %708 = vmatprep.mubr.msk.f32.mxu1 %vm777_vm0, %v778_v9 }
 0x174   :  { %747 = vmatprep.subr.bf16.mxu1 %v776_v5 }
 0x245   :  { %v250_v30 = vpop.f32.mrb[0].mxu1 }
 0x246   :  { %v251_v31 = vadd.f32 %v250_v30, %v99_v29  ;;  %v696_v32 = vpop.f32.mrb[1].mxu1 }
 0x248   :  { %763 = vtanh.f32 %v251_v31 }
 0x252   :  { %v764_v33 = vpop.eup %763 }
 0x253   :  { %702 = vmatmul.mubr.msk.f32.vlgmr.msra.gmra.mrb[2].mxu0 %vm106_vm1, %v764_v33 }
 0x254   :  { %746 = vmatpush3.bf16.msra.mxu0 %v832_v8  ;;  %715 = vmatprep.mubr.msk.f32.mxu0 %vm777_vm0, %v778_v9 }
 0x255   :  { %750 = vmatprep.subr.bf16.mxu0 %v776_v5  ;;  %v660_v5 = vld [vmem:[%s914_s4] ss:$0 sm:$0xff] }
 0x326   :  { %v324_v37 = vpop.f32.mrb[2].mxu0 }
 0x327   :  { %v325_v38 = vadd.f32 %v324_v37, %v100_v36  ;;  %v703_v39 = vpop.f32.mrb[3].mxu0 }
 0x329   :  { %765 = vtanh.f32 %v325_v38 }
 0x333   :  { %v766_v40 = vpop.eup %765 }
 0x334   :  { %709 = vmatmul.mubr.msk.f32.vlgmr.msra.gmra.mrb[2].mxu1 %vm106_vm1, %v766_v40 }
 0x335   :  { %749 = vmatpush3.bf16.msra.mxu1 %v832_v8  ;;  %722 = vmatprep.mubr.msk.f32.mxu1 %vm777_vm0, %v778_v9 }
 0x407   :  { %v398_v44 = vpop.f32.mrb[2].mxu1 }
 0x408   :  { %v399_v45 = vadd.f32 %v398_v44, %v101_v43  ;;  %v710_v46 = vpop.f32.mrb[3].mxu1 }
 0x40a   :  { %767 = vtanh.f32 %v399_v45 }
 0x414   :  { %v768_v47 = vpop.eup %767 }
 0x415   :  { %716 = vmatmul.mubr.msk.f32.vlgmr.msra.gmra.mrb[4].mxu0 %vm106_vm1, %v768_v47 }
 0x416   :  { %752 = vmatpush3.bf16.msra.mxu0 %v832_v8  ;;  %729 = vmatprep.mubr.msk.f32.mxu0 %vm777_vm0, %v778_v9  ;;  %v661_v9 = vld [vmem:[#allocation2] ss:$0 sm:$0xff] }
 0x4e8   :  { %v472_v51 = vpop.f32.mrb[4].mxu0 }
 0x4e9   :  { %v473_v52 = vadd.f32 %v472_v51, %v102_v50  ;;  %v717_v53 = vpop.f32.mrb[5].mxu0 }
 0x4eb   :  { %769 = vtanh.f32 %v473_v52 }
 0x4f5   :  { %v770_v54 = vpop.eup %769 }
 0x4f6   :  { %723 = vmatmul.mubr.msk.f32.vlgmr.msra.gmra.mrb[4].mxu1 %vm106_vm1, %v770_v54 }
 0x5c9   :  { %v546_v58 = vpop.f32.mrb[4].mxu1 }
 0x5ca   :  { %v547_v59 = vadd.f32 %v546_v58, %v103_v57  ;;  %v724_v60 = vpop.f32.mrb[5].mxu1 }
 0x5cc   :  { %771 = vtanh.f32 %v547_v59 }
 0x5d6   :  { %v772_v61 = vpop.eup %771 }
 0x5d7   :  { %730 = vmatmul.mubr.msk.f32.vlgmr.msra.gmra.mrb[6].mxu0 %vm106_vm1, %v772_v61 }
 0x6aa   :  { %v620_v2 = vpop.f32.mrb[6].mxu0 }
 0x6ab   :  { %v621_v3 = vadd.f32 %v620_v2, %v104_v1  ;;  %v731_v4 = vpop.f32.mrb[7].mxu0 }
 0x6ad   :  { %773 = vtanh.f32 %v621_v3 }
 0x6b7   :  { %v774_v6 = vpop.eup %773 }
 0x6b8   :  { %v632_v7 = vmul.f32 %v774_v6, %v660_v5 }
 0x6ba   :  { %v634_v8 = vsel %vm633_vm2, %v632_v7, 0.0 }
 0x6bb   :  { %635 = vadd.xlane.f32.xlu0 %v634_v8 }
 0x748   :  { %v636_v12 = vpop.xlane.xlu0 %635 }
 0x749   :  { %v644_v13 = vadd.f32 %v661_v9, %v636_v12 }
 0x74b   :  { %646 = vst.msk [vmem:[%s915_s6] sm:$0x3] %vm645_vm3, %v644_v13 }

</bundles_post_ra>
